<compile_context>
chip_gen: v7x
topology: tpu7x:2x2x1
jax: 0.10.0
libtpu: 0.0.40
codegen_flags: <defaults>
</compile_context>

<pallas_src>
import jax
import jax.numpy as jnp
import numpy as np
from jax.experimental import pallas as pl
from jax.experimental.pallas import tpu as pltpu


HID = 32          # hid
IN_FEATURES = 2   # Linear(2, hid)


def _round_up(n, m):
    return ((n + m - 1) // m) * m


def _mxu_prefers_bf16():
    """bf16 activations/MXU inputs on v6e/v7x; keep f32 on v5e and older."""
    try:
        kind = jax.devices()[0].device_kind.lower()
    except Exception:
        return False
    return not any(old in kind for old in ("v2", "v3", "v4", "v5"))


def mlp_kernel(x_ref, w1_ref, b1_ref, w2_ref, b2_ref, w3_ref, b3_ref, out_ref):
    # Transposed layout: batch on lanes.
    #   x_ref  : (2, TB)        streamed input tile
    #   w1_ref : (hid, 2)       hidden1.weight (PyTorch [out, in] layout), f32
    #   b1_ref : (hid, 1)       hidden1.bias as a column, f32
    #   w2_ref : (hid, hid)     hidden2.weight (bf16 on v6e/v7x, f32 on v5e)
    #   b2_ref : (hid, 1)       f32
    #   w3_ref : (hid, 1)       output.weight^T, f32
    #   b3_ref : (1,)  in SMEM  output.bias scalar
    #   out_ref: (1, TB)        f32
    act_dtype = w2_ref.dtype                                  # bf16 on v6e/v7x, f32 on v5e
    x = x_ref[...]                                            # (2, TB)
    w1 = w1_ref[...]                                          # (hid, 2)

    # Layer 1 (K=2): two broadcast FMAs on the VPU instead of a padded MXU push.
    pre1 = w1[:, 0:1] * x[0:1, :] + w1[:, 1:2] * x[1:2, :] + b1_ref[...]
    h1 = jnp.tanh(pre1.astype(act_dtype))                     # (hid, TB)

    # Layer 2 (hid x hid): MXU matmul (bf16 inputs where supported, f32 accumulate).
    pre2 = jnp.dot(w2_ref[...], h1, preferred_element_type=jnp.float32) + b2_ref[...]
    h2 = jnp.tanh(pre2.astype(act_dtype))                     # (hid, TB)

    # Layer 3 (N=1): elementwise multiply + sublane reduce (VPU/XLU) in f32.
    y = jnp.sum(w3_ref[...] * h2, axis=0, keepdims=True) + b3_ref[0]
    out_ref[...] = jax.nn.sigmoid(y)                          # (1, TB)


def network_forward(x, params, *, tile_b=16384, use_bf16_matmul=None):
    """Forward pass of Network(layer=2, hid).  x: (B, ...) -> (B, 1)."""
    w1, b1, w2, b2, w3, b3 = params
    hid = w1.shape[0]
    if use_bf16_matmul is None:
        use_bf16_matmul = _mxu_prefers_bf16()

    B = x.shape[0]
    x2d = x.reshape(B, -1).astype(jnp.float32)                # (B, 2), like input.view(B, -1)
    xt = x2d.T                                                # (2, B): batch -> lanes
    # TODO(synk): accept a pre-transposed (2, B) input to skip this HBM relayout pass.

    # Lane-dense batch tile: always a multiple of 128; big enough (default 16K) to
    # amortize per-grid-step overhead, but capped at ~B/2 so moderate batches still
    # produce >=2 grid blocks (keeps both TensorCores busy on v7x).
    tile_b = max(128, _round_up(tile_b, 128))
    tile = min(tile_b, max(128, _round_up(pl.cdiv(B, 2), 128)))
    grid = (pl.cdiv(B, tile),)                                # Pallas masks the partial edge block

    # bf16 weights for the MXU on v6e/v7x (f32 accumulate inside the kernel).
    w2_mx = w2.astype(jnp.bfloat16) if use_bf16_matmul else w2

    # Raise scoped VMEM only if an oversized tile actually needs it (v5e default is 16 MiB).
    est_bytes = 4 * tile * (2 * (IN_FEATURES + 1) + 2 * hid) + (1 << 20)
    vmem_limit = None if est_bytes <= (16 << 20) else min(2 * est_bytes, 64 << 20)

    def const_spec(shape):
        # Weights/biases: whole array, same block every step -> VMEM-resident.
        return pl.BlockSpec(shape, lambda i: (0, 0))

    out_t = pl.pallas_call(
        mlp_kernel,
        out_shape=jax.ShapeDtypeStruct((1, B), jnp.float32),
        grid=grid,
        in_specs=[
            pl.BlockSpec((IN_FEATURES, tile), lambda i: (0, i)),   # streamed input
            const_spec((hid, IN_FEATURES)),                        # w1
            const_spec((hid, 1)),                                  # b1
            const_spec((hid, hid)),                                # w2 (maybe bf16)
            const_spec((hid, 1)),                                  # b2
            const_spec((hid, 1)),                                  # w3
            pl.BlockSpec(memory_space=pltpu.MemorySpace.SMEM),     # b3 scalar
        ],
        out_specs=pl.BlockSpec((1, tile), lambda i: (0, i)),
        compiler_params=pltpu.CompilerParams(
            dimension_semantics=("parallel",),                     # megacore on v7x
            vmem_limit_bytes=vmem_limit,
        ),
    )(xt, w1, b1, w2_mx, b2, w3, b3)

    return out_t.T                                            # (B, 1)


def init_params(key, hid):
    """Deterministic init matching nn.Linear default (uniform +-1/sqrt(fan_in))."""
    ks = jax.random.split(key, 6)

    def uniform(k, shape, fan_in):
        bound = 1.0 / np.sqrt(fan_in)
        return jax.random.uniform(k, shape, jnp.float32, -bound, bound)

    w1 = uniform(ks[0], (hid, IN_FEATURES), IN_FEATURES)  # hidden1.weight (hid, 2)
    b1 = uniform(ks[1], (hid, 1), IN_FEATURES)            # hidden1.bias (column)
    w2 = uniform(ks[2], (hid, hid), hid)                  # hidden2.weight (hid, hid)
    b2 = uniform(ks[3], (hid, 1), hid)                    # hidden2.bias (column)
    w3 = uniform(ks[4], (hid, 1), hid)                    # output.weight^T (hid, 1)
    b3 = uniform(ks[5], (1,), hid)                        # output.bias scalar
    return (w1, b1, w2, b2, w3, b3)


def reference_forward(x, params):
    """Pure-JAX f32 reference matching the PyTorch forward."""
    w1, b1, w2, b2, w3, b3 = params
    x2d = x.reshape(x.shape[0], -1).astype(jnp.float32)
    h1 = jnp.tanh(x2d @ w1.T + b1.T)
    h2 = jnp.tanh(h1 @ w2.T + b2.T)
    return jax.nn.sigmoid(h2 @ w3 + b3)


if __name__ == "__main__":
    key = jax.random.PRNGKey(0)
    kx, kp, kx2 = jax.random.split(key, 3)
    params = init_params(kp, HID)

    use_bf16 = _mxu_prefers_bf16()
    # sigmoid outputs live in (0, 1): absolute tolerance is the meaningful check.
    atol = 3e-2 if use_bf16 else 1e-5
    rtol = 0.0 if use_bf16 else 1e-5

    # Small shape consistent with the module: input.view(B, -1) -> (B, 2).
    x_small = jax.random.normal(kx, (8, 2), jnp.float32)
    out_small = jax.block_until_ready(network_forward(x_small, params))
    np.testing.assert_allclose(
        np.asarray(out_small), np.asarray(reference_forward(x_small, params)),
        rtol=rtol, atol=atol)
    assert out_small.shape == (8, 1)

    # Exercise the batch-tiled grid (>=2 blocks) and the masked partial edge block.
    x_big = jax.random.normal(kx2, (1000, 2), jnp.float32)
    out_big = jax.block_until_ready(network_forward(x_big, params))
    np.testing.assert_allclose(
        np.asarray(out_big), np.asarray(reference_forward(x_big, params)),
        rtol=rtol, atol=atol)
    assert out_big.shape == (1000, 1)

    print("KERNEL_OK")
</pallas_src>

<mosaic_0001>
module attributes {stable_mosaic.version = 11 : i64} {
  func.func @mlp_kernel(%arg0: i32, %arg1: memref<2x128xf32, #tpu.memory_space<vmem>>, %arg2: memref<32x2xf32, #tpu.memory_space<vmem>>, %arg3: memref<32x1xf32, #tpu.memory_space<vmem>>, %arg4: memref<32x32xbf16, #tpu.memory_space<vmem>>, %arg5: memref<32x1xf32, #tpu.memory_space<vmem>>, %arg6: memref<32x1xf32, #tpu.memory_space<vmem>>, %arg7: memref<1xf32, #tpu.memory_space<smem>>, %arg8: memref<1x128xf32, #tpu.memory_space<vmem>>) attributes {dimension_semantics = [#tpu.dimension_semantics<parallel>], iteration_bounds = array<i64: 1>, scalar_prefetch = 0 : i64, scratch_operands = 0 : i64, tpu.core_type = #tpu.core_type<tc>, window_params = [{transform_indices = @transform_0, window_bounds = array<i64: 2, 128>}, {pipeline_mode = #tpu.pipeline_mode<synchronous>, transform_indices = @transform_1, window_bounds = array<i64: 32, 2>}, {pipeline_mode = #tpu.pipeline_mode<synchronous>, transform_indices = @transform_2, window_bounds = array<i64: 32, 1>}, {pipeline_mode = #tpu.pipeline_mode<synchronous>, transform_indices = @transform_3, window_bounds = array<i64: 32, 32>}, {pipeline_mode = #tpu.pipeline_mode<synchronous>, transform_indices = @transform_4, window_bounds = array<i64: 32, 1>}, {pipeline_mode = #tpu.pipeline_mode<synchronous>, transform_indices = @transform_5, window_bounds = array<i64: 32, 1>}, {transform_indices = @transform_6, window_bounds = array<i64: 1>}, {transform_indices = @transform_7, window_bounds = array<i64: 1, 128>}]} {
    %c0 = arith.constant 0 : index
    %c0_0 = arith.constant 0 : index
    %0 = vector.load %arg1[%c0, %c0_0] : memref<2x128xf32, #tpu.memory_space<vmem>>, vector<2x128xf32>
    %c0_1 = arith.constant 0 : index
    %c0_2 = arith.constant 0 : index
    %1 = vector.load %arg2[%c0_1, %c0_2] : memref<32x2xf32, #tpu.memory_space<vmem>>, vector<32x2xf32>
    %2 = vector.extract_strided_slice %1 {offsets = [0, 0], sizes = [32, 1], strides = [1, 1]} : vector<32x2xf32> to vector<32x1xf32>
    %3 = vector.extract_strided_slice %0 {offsets = [0, 0], sizes = [1, 128], strides = [1, 1]} : vector<2x128xf32> to vector<1x128xf32>
    %4 = vector.broadcast %2 : vector<32x1xf32> to vector<32x128xf32>
    %5 = vector.broadcast %3 : vector<1x128xf32> to vector<32x128xf32>
    %6 = arith.mulf %4, %5 : vector<32x128xf32>
    %7 = vector.extract_strided_slice %1 {offsets = [0, 1], sizes = [32, 1], strides = [1, 1]} : vector<32x2xf32> to vector<32x1xf32>
    %8 = vector.extract_strided_slice %0 {offsets = [1, 0], sizes = [1, 128], strides = [1, 1]} : vector<2x128xf32> to vector<1x128xf32>
    %9 = vector.broadcast %7 : vector<32x1xf32> to vector<32x128xf32>
    %10 = vector.broadcast %8 : vector<1x128xf32> to vector<32x128xf32>
    %11 = arith.mulf %9, %10 : vector<32x128xf32>
    %12 = arith.addf %6, %11 : vector<32x128xf32>
    %c0_3 = arith.constant 0 : index
    %c0_4 = arith.constant 0 : index
    %13 = vector.load %arg3[%c0_3, %c0_4] : memref<32x1xf32, #tpu.memory_space<vmem>>, vector<32x1xf32>
    %14 = vector.broadcast %13 : vector<32x1xf32> to vector<32x128xf32>
    %15 = arith.addf %12, %14 : vector<32x128xf32>
    %16 = arith.truncf %15 : vector<32x128xf32> to vector<32x128xbf16>
    %17 = math.tanh %16 : vector<32x128xbf16>
    %c0_5 = arith.constant 0 : index
    %c0_6 = arith.constant 0 : index
    %18 = vector.load %arg4[%c0_5, %c0_6] : memref<32x32xbf16, #tpu.memory_space<vmem>>, vector<32x32xbf16>
    %cst = arith.constant dense<0.000000e+00> : vector<32x128xf32>
    %19 = tpu.matmul %18, %17, %cst {dimension_numbers = #tpu.dot_dimension_numbers<[1], [0], [0], [1], [0, 0, 1, 1], [], []>} : vector<32x32xbf16>, vector<32x128xbf16>, vector<32x128xf32> -> vector<32x128xf32>
    %c0_7 = arith.constant 0 : index
    %c0_8 = arith.constant 0 : index
    %20 = vector.load %arg5[%c0_7, %c0_8] : memref<32x1xf32, #tpu.memory_space<vmem>>, vector<32x1xf32>
    %21 = vector.broadcast %20 : vector<32x1xf32> to vector<32x128xf32>
    %22 = arith.addf %19, %21 : vector<32x128xf32>
    %23 = arith.truncf %22 : vector<32x128xf32> to vector<32x128xbf16>
    %24 = math.tanh %23 : vector<32x128xbf16>
    %c0_9 = arith.constant 0 : index
    %c0_10 = arith.constant 0 : index
    %25 = vector.load %arg6[%c0_9, %c0_10] : memref<32x1xf32, #tpu.memory_space<vmem>>, vector<32x1xf32>
    %26 = arith.extf %24 : vector<32x128xbf16> to vector<32x128xf32>
    %27 = vector.broadcast %25 : vector<32x1xf32> to vector<32x128xf32>
    %28 = arith.mulf %27, %26 : vector<32x128xf32>
    %cst_11 = arith.constant dense<0.000000e+00> : vector<128xf32>
    %29 = vector.multi_reduction <add>, %28, %cst_11 [0] : vector<32x128xf32> to vector<128xf32>
    %30 = vector.shape_cast %29 : vector<128xf32> to vector<1x128xf32>
    %c0_12 = arith.constant 0 : index
    %31 = memref.load %arg7[%c0_12] : memref<1xf32, #tpu.memory_space<smem>>
    %32 = vector.broadcast %31 : f32 to vector<1x128xf32>
    %33 = arith.addf %30, %32 : vector<1x128xf32>
    %34 = arith.negf %33 : vector<1x128xf32>
    %35 = math.exp %34 : vector<1x128xf32>
    %cst_13 = arith.constant 1.000000e+00 : f32
    %36 = vector.broadcast %cst_13 : f32 to vector<1x128xf32>
    %37 = arith.addf %36, %35 : vector<1x128xf32>
    %38 = arith.divf %36, %37 : vector<1x128xf32>
    %c0_14 = arith.constant 0 : index
    %c0_15 = arith.constant 0 : index
    %39 = vector.load %arg8[%c0_14, %c0_15] : memref<1x128xf32, #tpu.memory_space<vmem>>, vector<1x128xf32>
    tpu.vector_store %arg8[%c0_14, %c0_15], %38 {strides = array<i32>} : memref<1x128xf32, #tpu.memory_space<vmem>>, vector<1x128xf32>,
    return
  }
  func.func @transform_0(%arg0: i32) -> (i32, i32) {
    %c0_i32 = arith.constant 0 : i32
    %c0_i32_0 = arith.constant 0 : i32
    return %c0_i32, %arg0 : i32, i32
  }
  func.func @transform_1(%arg0: i32) -> (i32, i32) {
    %c0_i32 = arith.constant 0 : i32
    %c0_i32_0 = arith.constant 0 : i32
    %c0_i32_1 = arith.constant 0 : i32
    return %c0_i32, %c0_i32_0 : i32, i32
  }
  func.func @transform_2(%arg0: i32) -> (i32, i32) {
    %c0_i32 = arith.constant 0 : i32
    %c0_i32_0 = arith.constant 0 : i32
    %c0_i32_1 = arith.constant 0 : i32
    return %c0_i32, %c0_i32_0 : i32, i32
  }
  func.func @transform_3(%arg0: i32) -> (i32, i32) {
    %c0_i32 = arith.constant 0 : i32
    %c0_i32_0 = arith.constant 0 : i32
    %c0_i32_1 = arith.constant 0 : i32
    return %c0_i32, %c0_i32_0 : i32, i32
  }
  func.func @transform_4(%arg0: i32) -> (i32, i32) {
    %c0_i32 = arith.constant 0 : i32
    %c0_i32_0 = arith.constant 0 : i32
    %c0_i32_1 = arith.constant 0 : i32
    return %c0_i32, %c0_i32_0 : i32, i32
  }
  func.func @transform_5(%arg0: i32) -> (i32, i32) {
    %c0_i32 = arith.constant 0 : i32
    %c0_i32_0 = arith.constant 0 : i32
    %c0_i32_1 = arith.constant 0 : i32
    return %c0_i32, %c0_i32_0 : i32, i32
  }
  func.func @transform_6(%arg0: i32) -> i32 {
    %c0_i32 = arith.constant 0 : i32
    %c0_i32_0 = arith.constant 0 : i32
    return %c0_i32 : i32
  }
  func.func @transform_7(%arg0: i32) -> (i32, i32) {
    %c0_i32 = arith.constant 0 : i32
    %c0_i32_0 = arith.constant 0 : i32
    return %c0_i32, %arg0 : i32, i32
  }
}

</mosaic_0001>

<bundles_post_ra>
// kernel: tpu_custom_call.1
= control target key start
LH: loop header
LB: loop body
LE: loop exit
PB: predicated region body
PF: predicated region fallthrough
CT: control target
= control target key end

     0   :  { %v349_v2 = vmov 1   ;;  %v350_v4 = vmov 0   ;;  %s466_s0 = inlined_call_operand.vmem [shape: f32[2,8], index: 0, kind: input, shape index: {}]   ;;  %s467_s1 = inlined_call_operand.vmem [shape: f32[32,2], index: 1, kind: input, shape index: {}]   ;;  %s468_s2 = inlined_call_operand.vmem [shape: f32[32,1], index: 2, kind: input, shape index: {}]   ;;  %s469_s3 = inlined_call_operand.vmem [shape: bf16[32,32], index: 3, kind: input, shape index: {}]   ;;  %s470_s4 = inlined_call_operand.vmem [shape: f32[32,1], index: 4, kind: input, shape index: {}]   ;;  %s471_s5 = inlined_call_operand.vmem [shape: f32[32,1], index: 5, kind: input, shape index: {}]   ;;  %s472_s6 = inlined_call_operand.<no memory space> [shape: f32[1], index: 6, kind: input, shape index: {}]   ;;  %s473_s7 = inlined_call_operand.hbm [shape: f32[1,8], index: 7, kind: output, shape index: {}]  }
   0x1   :  { %v32_v0 = vld [vmem:[%s467_s1 + $0x10] sm:$0xff]  ;;  %v30_v1 = vld [vmem:[%s467_s1] sm:$0xff]  ;;  %307 = vset.pattern.permute.xlu0 %v349_v2  ;;  %305 = vset.pattern.permute.xlu1 %v349_v2  ;;  %v31_v3 = vld [vmem:[%s467_s1 + $0x8] sm:$0xff] }
   0x2   :  { %71 = vperm.xlu0 %307, %v32_v0   ;;  %63 = vperm.xlu1 %305, %v30_v1  }
   0x6   :  { %308 = vset.pattern.permute.xlu0 %v350_v4  ;;  %67 = vperm.xlu1 %305, %v31_v3  }
   0x7   :  { %36 = vperm.xlu0 %308, %v30_v1  }
   0x8   :  { %13 = vsyncpa [#allocation4], 0  ;;  %v33_v5 = vld [vmem:[%s467_s1 + $0x18] sm:$0xff]  ;;  %v91_v6 = vld [vmem:[%s468_s2 + $0x8] sm:$0xff]  ;;  %vm160_vm0 = vcmask 261120   ;;  %v54_v19 = vlaneseq  ;;  %s351_s12 = smov [#allocation3]  }
   0x9   :  { %v90_v7 = vld [vmem:[%s468_s2] sm:$0xff]  ;;  %v92_v9 = vld [vmem:[%s468_s2 + $0x10] sm:$0xff]  ;;  %v93_v11 = vld [vmem:[%s468_s2 + $0x18] sm:$0xff]  ;;  %s277_s13 = sshll.u32 %s351_s12, 4  ;;  %s278_s13 = int_to_ptr.vmem [resolvable:$true] %s277_s13 }
   0xa   :  { %306 = vset.pattern.permute.xlu1 %v350_v4  ;;  %v126_v8 = vld [vmem:[%s470_s4] sm:$0xff]  ;;  %v128_v10 = vld [vmem:[%s470_s4 + $0x10] sm:$0xff]  ;;  %v127_v13 = vld [vmem:[%s470_s4 + $0x8] sm:$0xff]  ;;  %v55_v22 = vshrl.u32 %v54_v19, 7  ;;  %s325_s14 = scalar_lea.vmem %s278_s13, 16  ;;  %s329_s1 = scalar_lea.vmem %s278_s13, 32 }
   0xb   :  { %41 = vperm.xlu0 %308, %v31_v3   ;;  %51 = vperm.xlu1 %306, %v33_v5   ;;  %v220_v12 = vld [vmem:[%s471_s5] sm:$0xff]  ;;  %v222_v14 = vld [vmem:[%s471_s5 + $0x10] sm:$0xff]  ;;  %v129_v15 = vld [vmem:[%s470_s4 + $0x18] sm:$0xff]  ;;  %p326_p0 = scmp.ne.s32.totalorder %s278_s13, %s325_s14  ;;  %p330_p1 = scmp.lt.s32.totalorder %s278_s13, %s278_s13 }
   0xc   :  { %v221_v16 = vld [vmem:[%s471_s5 + $0x8] sm:$0xff]  ;;  %v223_v17 = vld [vmem:[%s471_s5 + $0x18] sm:$0xff]  ;;  %v311_v18 = vld [vmem:[%s469_s3] sm:$0xff]   ;;  %v56_v25 = vsub.s32 0, %v55_v22  ;;  %v80_v26 = vsub.s32 1, %v55_v22  ;;  %p331_p2 = scmp.lt.s32.totalorder %s329_s1, %s325_s14 }
   0xd   :  { %298 = vmatprep.mubr.msk.bf16.mxu0 %vm160_vm0, %v311_v18  ;;  %v29_v27 = vld [vmem:[%s466_s0] sm:$0x3]  ;;  %v312_v58 = vld [vmem:[%s469_s3 + $0x8] sm:$0xff]  }
   0xe   :  { %v57_v30 = vrot.slane %v29_v27, %v56_v25  ;;  %v81_v31 = vrot.slane %v29_v27, %v80_v26  ;;  %p332_p3 = por %p331_p2, %p330_p1 }
   0xf   :  { %46 = vperm.xlu0 %308, %v32_v0   ;;  %309 = vset.pattern.permute.xlu1 %v349_v2 }
  0x10   :  { %75 = vperm.xlu1 %309, %v33_v5   ;;  %p333_p4 = pnand %p332_p3, %p326_p0 }
  0x13   :  { %101 = vperm.xlu0 %308, %v91_v6  }
  0x14   :  { %310 = vset.pattern.permute.xlu1 %v350_v4 }
  0x15   :  { %96 = vperm.xlu1 %310, %v90_v7  }
  0x17   :  { %132 = vperm.xlu0 %308, %v126_v8  }
  0x19   :  { %106 = vperm.xlu1 %310, %v92_v9  }
  0x1b   :  { %142 = vperm.xlu0 %308, %v128_v10  }
  0x1d   :  { %111 = vperm.xlu1 %310, %v93_v11  }
  0x1f   :  { %230 = vperm.xlu0 %308, %v220_v12  }
  0x21   :  { %137 = vperm.xlu1 %310, %v127_v13  }
  0x23   :  { %240 = vperm.xlu0 %308, %v222_v14  }
  0x25   :  { %147 = vperm.xlu1 %310, %v129_v15  }
  0x29   :  { %235 = vperm.xlu1 %310, %v221_v16  }
  0x2d   :  { %245 = vperm.xlu1 %310, %v223_v17  }
  0x81   :  { %v64_v20 = vpop.permute.xlu1 %63  ;;  %v72_v21 = vpop.permute.xlu0 %71 }
  0x82   :  { %v82_v36 = vmul.f32 %v81_v31, %v64_v20  ;;  %v84_v48 = vmul.f32 %v81_v31, %v72_v21 }
  0x85   :  { %v68_v23 = vpop.permute.xlu1 %67 }
  0x86   :  { %v37_v24 = vpop.permute.xlu0 %36  ;;  %v83_v37 = vmul.f32 %v81_v31, %v68_v23 }
  0x87   :  { %v58_v33 = vmul.f32 %v57_v30, %v37_v24 }
  0x89   :  { %v86_v40 = vadd.f32 %v82_v36, %v58_v33 }
  0x8a   :  { %v42_v28 = vpop.permute.xlu0 %41  ;;  %v52_v29 = vpop.permute.xlu1 %51 }
  0x8b   :  { %v59_v34 = vmul.f32 %v57_v30, %v42_v28  ;;  %v61_v49 = vmul.f32 %v57_v30, %v52_v29 }
  0x8d   :  { %v87_v39 = vadd.f32 %v83_v37, %v59_v34 }
  0x8e   :  { %v47_v32 = vpop.permute.xlu0 %46 }
  0x8f   :  { %v76_v35 = vpop.permute.xlu1 %75  ;;  %v60_v44 = vmul.f32 %v57_v30, %v47_v32 }
  0x90   :  { %v85_v45 = vmul.f32 %v81_v31, %v76_v35  ;;  %v262_v31 = vstv %s472_s6 }
  0x91   :  { %v88_v50 = vadd.f32 %v84_v48, %v60_v44 }
  0x92   :  { %v102_v38 = vpop.permute.xlu0 %101  ;;  %v89_v51 = vadd.f32 %v85_v45, %v61_v49 }
  0x93   :  { %v115_v42 = vadd.f32 %v102_v38, %v87_v39 }
  0x94   :  { %v97_v41 = vpop.permute.xlu1 %96 }
  0x95   :  { %v114_v43 = vadd.f32 %v97_v41, %v86_v40 }
  0x96   :  { %v133_v59 = vpop.permute.xlu0 %132 }
  0x97   :  { %v118_v46 = vpack.c.bf16 %v115_v42, %v114_v43 }
  0x98   :  { %v107_v47 = vpop.permute.xlu1 %106 }
  0x99   :  { %313 = vtanh.bf16 %v118_v46  ;;  %v116_v53 = vadd.f32 %v107_v47, %v88_v50 }
  0x9a   :  { %v143_v62 = vpop.permute.xlu0 %142 }
  0x9c   :  { %v112_v52 = vpop.permute.xlu1 %111 }
  0x9d   :  { %v117_v54 = vadd.f32 %v112_v52, %v89_v51 }
  0x9e   :  { %v231_v9 = vpop.permute.xlu0 %230 }
  0x9f   :  { %v119_v55 = vpack.c.bf16 %v117_v54, %v116_v53 }
  0xa0   :  { %v138_v60 = vpop.permute.xlu1 %137 }
  0xa1   :  { %315 = vtanh.bf16 %v119_v55 }
  0xa2   :  { %v241_v19 = vpop.permute.xlu0 %240 }
  0xa4   :  { %v314_v56 = vpop.eup %313  ;;  %v148_v0 = vpop.permute.xlu1 %147 }
  0xa5   :  { %294 = vmatprep.subr.bf16.mxu0 %v314_v56 }
  0xa6   :  { %295 = vmatpush3.bf16.msra.mxu0 %v314_v56 }
  0xa8   :  { %v236_v12 = vpop.permute.xlu1 %235 }
  0xac   :  { %v316_v57 = vpop.eup %315  ;;  %v246_v22 = vpop.permute.xlu1 %245 }
  0xad   :  { %296 = vmatprep.subr.bf16.mxu0 %v316_v57 }
  0xae   :  { %297 = vmatpush3.bf16.msra.mxu0 %v316_v57 }
  0xb1   :  { %299 = vmatmul.mubr.msk.bf16.vlgmr.msra.gmra.mrb[0].mxu0 %vm160_vm0, %v312_v58 }
 0x184   :  { %v300_v61 = vpop.f32.mrb[0].mxu0 }
 0x185   :  { %v201_v63 = vpop.f32.mrb[1].mxu0  ;;  %v210_v2 = vadd.f32 %v300_v61, %v143_v62 }
 0x186   :  { %v301_v1 = vpop.f32.mrb[2].mxu0  ;;  %v202_v5 = vadd.f32 %v201_v63, %v133_v59 }
 0x187   :  { %v213_v3 = vadd.f32 %v301_v1, %v148_v0  ;;  %v204_v4 = vpop.f32.mrb[3].mxu0 }
 0x188   :  { %v205_v6 = vadd.f32 %v204_v4, %v138_v60 }
 0x189   :  { %v217_v7 = vpack.c.bf16 %v213_v3, %v210_v2 }
 0x18a   :  { %v216_v8 = vpack.c.bf16 %v205_v6, %v202_v5 }
 0x18b   :  { %317 = vtanh.bf16 %v217_v7 }
 0x18c   :  { %319 = vtanh.bf16 %v216_v8 }
 0x196   :  { %v318_v10 = vpop.eup %317 }
 0x197   :  { %v320_v11 = vpop.eup %319  ;;  %v226_v13 = vunpack.c.l.bf16 %v318_v10  ;;  %v227_v16 = vunpack.c.h.bf16 %v318_v10 }
 0x198   :  { %v224_v14 = vunpack.c.l.bf16 %v320_v11  ;;  %v225_v15 = vunpack.c.h.bf16 %v320_v11 }
 0x199   :  { %v250_v20 = vmul.f32 %v241_v19, %v226_v13  ;;  %v251_v23 = vmul.f32 %v246_v22, %v227_v16 }
 0x19a   :  { %v248_v17 = vmul.f32 %v231_v9, %v224_v14  ;;  %v249_v18 = vmul.f32 %v236_v12, %v225_v15 }
 0x19c   :  { %v252_v21 = vadd.f32 %v249_v18, %v248_v17 }
 0x19e   :  { %v253_v24 = vadd.f32 %v252_v21, %v250_v20 }
 0x1a0   :  { %v254_v25 = vadd.f32 %v253_v24, %v251_v23 }
 0x1a2   :  { %v255_v26 = vrot.slane %v254_v25, 4 }
 0x1a4   :  { %v256_v27 = vadd.f32 %v255_v26, %v254_v25 }
 0x1a6   :  { %v257_v28 = vrot.slane %v256_v27, 2 }
 0x1a8   :  { %v258_v29 = vadd.f32 %v257_v28, %v256_v27 }
 0x1aa   :  { %v259_v30 = vrot.slane %v258_v29, 1 }
 0x1ac   :  { %v260_v32 = vadd.f32 %v259_v30, %v258_v29 }
 0x1ae   :  { %v263_v33 = vadd.f32 %v262_v31, %v260_v32 }
 0x1b0   :  { %v289_v34 = vmul.f32 -1.442695, %v263_v33 }
 0x1b2   :  { %321 = vpow2.f32 %v289_v34 }
 0x1bc   :  { %v322_v35 = vpop.eup %321 }
 0x1bd   :  { %v267_v36 = vadd.f32 1.0, %v322_v35 }
 0x1bf   :  { %323 = vrcp.f32 %v267_v36 }
 0x1c9   :  { %v324_v37 = vpop.eup %323 }
 0x1ca   :  { %270 = vst [vmem:[#allocation3] sm:$0x1] %v324_v37 }
 0x1cb   :  { %336 = shalt.err (!%p333_p4)
}
 0x1cc   :  { %s337_s16 = scalar_lea.hbm %s473_s7, 16 }
 0x1cd   :  { %p338_p5 = scmp.ne.s32.totalorder %s473_s7, %s337_s16  ;;  %p341_p6 = scmp.lt.u32.totalorder %s337_s16, %s473_s7 }
 0x1cf   :  { %p343_p7 = pnand %p341_p6, %p338_p5 }
 0x1d1   :  { %346 = shalt.err (!%p343_p7)
}
 0x1d2   :  { %280 = dma.vmem_to_hbm [thread:$0]  %s278_s13, 16, %s473_s7, [#allocation4]  }
 0x1d3   :  { %347 = dma.done.wait [#allocation4], 16  }
 0x1d4   :  { %348 = vsyncadd [#allocation4], 4294967280 }
 0x1d5   :  { %284 = vsyncpa [#allocation4], 1 }

</bundles_post_ra>
